<compile_context>
chip_gen: v6e
topology: v6e:2x2x1
jax: 0.10.0
libtpu: 0.0.40
codegen_flags: <defaults>
</compile_context>

<pallas_src>
import jax
import jax.numpy as jnp
from jax.experimental import pallas as pl
from jax.experimental.pallas import tpu as pltpu

EPS = 1e-5


def _fext_kernel(x_ref, w_ref, shift_ref, o_ref):
    """Fused: (folded linear+BN) -> relu -> +residual, channel-first layout.

    Blocks: x_ref/o_ref (nb, C, tt); w_ref (C_out, C_in); shift_ref (C_out, 1).
    """
    w = w_ref[...]                       # (C_out, C_in), grid-invariant, VMEM-resident
    shift = shift_ref[...]               # (C_out, 1) folded bias + BN shift
    nb = x_ref.shape[0]
    for i in range(nb):                  # static, small (<= 8); keeps each dot a clean 2-D MXU op
        xi = x_ref[i]                                                    # (C_in, tt)
        y = jnp.dot(w, xi, preferred_element_type=jnp.float32)           # (C_out, tt)
        y = jnp.maximum(y + shift, 0.0)                                  # folded shift + relu
        # TODO(synk): dropout is identity in eval mode; training-mode dropout / BN batch
        # statistics (running-stat updates) are not reproduced here.
        o_ref[i] = (y + xi).astype(o_ref.dtype)                          # residual add


def _choose_tiling(N, T, tt_max):
    """Pick (nb, tt): batch rows per block and time-tile size."""
    tt_max = max(128, (tt_max // 128) * 128)
    tt = T if T <= tt_max else tt_max                     # full extent or 128-aligned big tile
    nb = min(N, 8) if (T <= 512 and N > 1) else 1         # small-T: batch rows to fill lanes
    grid_n = -(-N // nb)
    grid_t = -(-T // tt)
    # v7x megacore: make sure there are >= 2 grid steps so both TensorCores get work.
    if grid_n * grid_t < 2:
        if T >= 256:
            tt = max(128, ((T // 2) // 128) * 128)
        elif N > 1:
            nb = -(-N // 2)
    return nb, tt


def linear_feature_extractor(x_nct, w, b, gamma, beta, run_mean, run_var,
                             *, eps=EPS, tt_max=4096, out_dtype=None):
    """x_nct: [N, C_in, T] float32 (channel-first). Returns [N, C_out, T].

    out_dtype: optionally emit bf16 output (halves the write stream, ~20-25% on this
    HBM-bound kernel); defaults to the input dtype.
    """
    N, C_in, T = x_nct.shape
    C_out = w.shape[0]
    assert C_in == C_out, "residual path requires in_channels == out_channels"
    out_dtype = x_nct.dtype if out_dtype is None else out_dtype

    # Fold eval-mode BatchNorm1d and the linear bias into the weight and one shift:
    #   (x@W^T + b - mean)*scale + beta == x @ (scale*W)^T + ((b - mean)*scale + beta)
    inv_std = 1.0 / jnp.sqrt(run_var + eps)
    scale = gamma * inv_std                                        # (C_out,)
    w_folded = (w * scale[:, None]).astype(jnp.float32)            # (C_out, C_in)
    shift = (((b - run_mean) * scale + beta)
             .reshape(C_out, 1).astype(jnp.float32))               # (C_out, 1)

    nb, tt = _choose_tiling(N, T, tt_max)
    grid = (pl.cdiv(N, nb), pl.cdiv(T, tt))                        # ragged blocks handled by Pallas

    # Explicit scoped-VMEM budget: generous for big tiles (v5e default is only 16 MiB)
    # but capped below v7x's 64 MiB physical VMEM.
    tile_bytes = nb * max(C_in, C_out) * tt * 4
    vmem_limit = int(min(48 * 2**20, max(32 * 2**20, 8 * tile_bytes + 2 * 2**20)))

    return pl.pallas_call(
        _fext_kernel,
        out_shape=jax.ShapeDtypeStruct((N, C_out, T), out_dtype),
        grid=grid,
        in_specs=[
            pl.BlockSpec((nb, C_in, tt), lambda n, t: (n, 0, t)),   # x tile: C on sublanes, T on lanes
            pl.BlockSpec((C_out, C_in), lambda n, t: (0, 0)),       # folded weight (grid-invariant)
            pl.BlockSpec((C_out, 1), lambda n, t: (0, 0)),          # folded bias+BN shift
        ],
        out_specs=pl.BlockSpec((nb, C_out, tt), lambda n, t: (n, 0, t)),
        compiler_params=pltpu.CompilerParams(
            dimension_semantics=("parallel", "parallel"),
            vmem_limit_bytes=vmem_limit),
    )(x_nct, w_folded, shift)


def _reference(x_nct, w, b, gamma, beta, run_mean, run_var, *, eps=EPS):
    x = jnp.transpose(x_nct, (0, 2, 1))                            # [N, T, C]
    res = x
    y = jnp.einsum("ntc,oc->nto", x, w) + b
    y = (y - run_mean) / jnp.sqrt(run_var + eps) * gamma + beta
    y = jnp.maximum(y, 0.0)
    y = y + res
    return jnp.transpose(y, (0, 2, 1))


if __name__ == "__main__":
    # module defaults: in_channels = out_channels = 64
    C = 64
    key = jax.random.PRNGKey(0)
    kx, kw, kb, kg, kbe, km, kv = jax.random.split(key, 7)

    # nn.Linear(64, 64): weight (out, in), bias (out,)
    w = jax.random.normal(kw, (C, C), dtype=jnp.float32) * 0.05
    b = jax.random.normal(kb, (C,), dtype=jnp.float32) * 0.05
    # BatchNorm1d(64) parameters / running stats (deterministic, non-trivial)
    gamma = 1.0 + 0.1 * jax.random.normal(kg, (C,), dtype=jnp.float32)
    beta = 0.1 * jax.random.normal(kbe, (C,), dtype=jnp.float32)
    run_mean = 0.1 * jax.random.normal(km, (C,), dtype=jnp.float32)
    run_var = 1.0 + 0.1 * jax.random.uniform(kv, (C,), dtype=jnp.float32)

    def check(N, T, seed, **kw_args):
        x = jax.random.normal(jax.random.PRNGKey(seed), (N, C, T), dtype=jnp.float32)
        out = linear_feature_extractor(x, w, b, gamma, beta, run_mean, run_var, **kw_args)
        out = jax.block_until_ready(out)
        ref = _reference(x, w, b, gamma, beta, run_mean, run_var)
        assert out.shape == (N, C, T)
        assert jnp.allclose(out, ref, atol=1e-5, rtol=1e-5), f"mismatch vs reference (N={N}, T={T})"

    # 1) default module-size config
    check(2, 16, 0)
    # 2) tiled path with a ragged last time block (no wrapper pad/slice)
    check(2, 200, 1, tt_max=128)
    # 3) small-T regime with multiple batch rows per block + ragged last batch block
    check(11, 100, 2)

    print("KERNEL_OK")
</pallas_src>

<mosaic_0001>
module attributes {stable_mosaic.version = 11 : i64} {
  func.func @_fext_kernel(%arg0: i32, %arg1: i32, %arg2: memref<1x64x16xf32, #tpu.memory_space<vmem>>, %arg3: memref<64x64xf32, #tpu.memory_space<vmem>>, %arg4: memref<64x1xf32, #tpu.memory_space<vmem>>, %arg5: memref<1x64x16xf32, #tpu.memory_space<vmem>>) attributes {dimension_semantics = [#tpu.dimension_semantics<parallel>, #tpu.dimension_semantics<parallel>], iteration_bounds = array<i64: 2, 1>, scalar_prefetch = 0 : i64, scratch_operands = 0 : i64, tpu.core_type = #tpu.core_type<tc>, window_params = [{transform_indices = @transform_0, window_bounds = array<i64: 1, 64, 16>}, {pipeline_mode = #tpu.pipeline_mode<synchronous>, transform_indices = @transform_1, window_bounds = array<i64: 64, 64>}, {pipeline_mode = #tpu.pipeline_mode<synchronous>, transform_indices = @transform_2, window_bounds = array<i64: 64, 1>}, {transform_indices = @transform_3, window_bounds = array<i64: 1, 64, 16>}]} {
    %c0 = arith.constant 0 : index
    %c0_0 = arith.constant 0 : index
    %0 = vector.load %arg3[%c0, %c0_0] : memref<64x64xf32, #tpu.memory_space<vmem>>, vector<64x64xf32>
    %c0_1 = arith.constant 0 : index
    %c0_2 = arith.constant 0 : index
    %1 = vector.load %arg4[%c0_1, %c0_2] : memref<64x1xf32, #tpu.memory_space<vmem>>, vector<64x1xf32>
    %c0_3 = arith.constant 0 : index
    %c0_4 = arith.constant 0 : index
    %c0_5 = arith.constant 0 : index
    %2 = vector.load %arg2[%c0_3, %c0_4, %c0_5] : memref<1x64x16xf32, #tpu.memory_space<vmem>>, vector<1x64x16xf32>
    %3 = vector.shape_cast %2 : vector<1x64x16xf32> to vector<64x16xf32>
    %cst = arith.constant dense<0.000000e+00> : vector<64x16xf32>
    %4 = tpu.matmul %0, %3, %cst {dimension_numbers = #tpu.dot_dimension_numbers<[1], [0], [0], [1], [0, 0, 1, 1], [], []>} : vector<64x64xf32>, vector<64x16xf32>, vector<64x16xf32> -> vector<64x16xf32>
    %5 = vector.broadcast %1 : vector<64x1xf32> to vector<64x16xf32>
    %6 = arith.addf %4, %5 : vector<64x16xf32>
    %cst_6 = arith.constant 0.000000e+00 : f32
    %7 = vector.broadcast %cst_6 : f32 to vector<64x16xf32>
    %8 = arith.maximumf %6, %7 : vector<64x16xf32>
    %9 = arith.addf %8, %3 : vector<64x16xf32>
    %c0_7 = arith.constant 0 : index
    %c0_8 = arith.constant 0 : index
    %c0_9 = arith.constant 0 : index
    %10 = vector.load %arg5[%c0_7, %c0_8, %c0_9] : memref<1x64x16xf32, #tpu.memory_space<vmem>>, vector<1x64x16xf32>
    %11 = vector.shape_cast %10 : vector<1x64x16xf32> to vector<64x16xf32>
    %12 = vector.shape_cast %9 : vector<64x16xf32> to vector<1x64x16xf32>
    tpu.vector_store %arg5[%c0_7, %c0_8, %c0_9], %12 {strides = array<i32>} : memref<1x64x16xf32, #tpu.memory_space<vmem>>, vector<1x64x16xf32>,
    return
  }
  func.func @transform_0(%arg0: i32, %arg1: i32) -> (i32, i32, i32) {
    %c0_i32 = arith.constant 0 : i32
    %c0_i32_0 = arith.constant 0 : i32
    return %arg0, %c0_i32, %arg1 : i32, i32, i32
  }
  func.func @transform_1(%arg0: i32, %arg1: i32) -> (i32, i32) {
    %c0_i32 = arith.constant 0 : i32
    %c0_i32_0 = arith.constant 0 : i32
    %c0_i32_1 = arith.constant 0 : i32
    return %c0_i32, %c0_i32_0 : i32, i32
  }
  func.func @transform_2(%arg0: i32, %arg1: i32) -> (i32, i32) {
    %c0_i32 = arith.constant 0 : i32
    %c0_i32_0 = arith.constant 0 : i32
    %c0_i32_1 = arith.constant 0 : i32
    return %c0_i32, %c0_i32_0 : i32, i32
  }
  func.func @transform_3(%arg0: i32, %arg1: i32) -> (i32, i32, i32) {
    %c0_i32 = arith.constant 0 : i32
    %c0_i32_0 = arith.constant 0 : i32
    return %arg0, %c0_i32, %arg1 : i32, i32, i32
  }
}

</mosaic_0001>

<bundles_post_ra>
// kernel: tpu_custom_call.1
= control target key start
LH: loop header
LB: loop body
LE: loop exit
PB: predicated region body
PF: predicated region fallthrough
CT: control target
= control target key end

     0   :  { %s657_s12 = smov 0   ;;  %s659_s13 = smov 0   ;;  %s830_s0 = inlined_call_operand.vmem [shape: f32[2,64,16], index: 0, kind: input, shape index: {}]   ;;  %s831_s1 = inlined_call_operand.vmem [shape: f32[64,64], index: 1, kind: input, shape index: {}]   ;;  %s832_s2 = inlined_call_operand.vmem [shape: f32[64,1], index: 2, kind: input, shape index: {}]   ;;  %s833_s3 = inlined_call_operand.vmem [shape: f32[2,64,16], index: 3, kind: output, shape index: {}]  }
   0x1   :  { %s661_s14 = smov 0  }
   0x2 LB: > { %s25_s15 = sadd.s32 1, %s630_s13  ;;  %p508_p0 = scmp.ge.s32.totalorder %s634_s14, 1  ;;  %s634_s14 = sphi %s661_s14, %s13_s14   ;;  %s630_s13 = sphi %s659_s13, %s835_s13   ;;  %s626_s12 = sphi %s657_s12, %s834_s12  }
   0x3   : > { %p27_p1 = scmp.ge.s32.totalorder %s25_s15, 2  ;;  %p156_p2 = scmp.lt.s32.totalorder %s634_s14, 3 }
   0x5   : > { %s837_s15 = smov (%p27_p1, %s25_s15), 0  ;;  %p157_p3 = pnand %p508_p0, %p156_p2 }
   0x6   : > { %p186_p4 = scmp.lt.s32.totalorder (!%p157_p3), %s626_s12, 1 }
   0x7   : > { %160 = sbr.rel (%p157_p3) target bundleno = 239 (0xef), region = 32 }
   0xc   : > { %v202_v0 = vld [vmem:[%s831_s1] sm:$0xff]  ;;  %vm266_vm0 = vcmask 523264   ;;  %s839_s12 = smov (!%p186_p4, %s626_s12), 1  ;;  %v636_v2 = vmov 0   ;;  %v212_v3 = vld [vmem:[%s832_s2 + $0x10] sm:$0xff]  ;;  %v203_v13 = vld [vmem:[%s831_s1 + $0x8] sm:$0xff] }
   0xd   : > { %v206_v1 = vld [vmem:[%s831_s1 + $0x20] sm:$0xff]  ;;  %557 = vmatprep.mubr.msk.f32.mxu0 %vm266_vm0, %v202_v0  ;;  %611 = vset.pattern.permute.xlu1 %v636_v2  ;;  %s523_s24 = sshll.u32 %s839_s12, 6  ;;  %v207_v14 = vld [vmem:[%s831_s1 + $0x28] sm:$0xff]  ;;  %v204_v15 = vld [vmem:[%s831_s1 + $0x10] sm:$0xff]  ;;  %vm412_vm1 = vcmask 130048  }
   0xe   : > { %563 = vmatprep.mubr.msk.f32.mxu1 %vm266_vm0, %v206_v1  ;;  %610 = vset.pattern.permute.xlu0 %v636_v2  ;;  %v210_v4 = vld [vmem:[%s832_s2] sm:$0xff]  ;;  %s697_s27 = scalar_lea.vmem %s830_s0, %s523_s24  ;;  %v208_v16 = vld [vmem:[%s831_s1 + $0x30] sm:$0xff]  ;;  %v213_v17 = vld [vmem:[%s832_s2 + $0x18] sm:$0xff]  ;;  %s796_s5 = scalar_lea.vmem %s833_s3, %s523_s24 }
   0xf   : > { %238 = vperm.xlu1 %611, %v212_v3   ;;  %228 = vperm.xlu0 %610, %v210_v4   ;;  %v700_v5 = vld [vmem:[%s697_s27 + $0x38] sm:$0xff]  ;;  %v703_v6 = vld [vmem:[%s697_s27 + $0x30] sm:$0xff]  ;;  %v710_v7 = vld [vmem:[%s697_s27 + $0x28] sm:$0xff] }
  0x10   : > { %541 = vmatprep.subr.mxu0 %v700_v5  ;;  %569 = vmatprep.subr.mxu1 %v700_v5  ;;  %v717_v8 = vld [vmem:[%s697_s27 + $0x20] sm:$0xff]  ;;  %v724_v9 = vld [vmem:[%s697_s27 + $0x18] sm:$0xff]  ;;  %v731_v10 = vld [vmem:[%s697_s27 + $0x10] sm:$0xff] }
  0x11   : > { %542 = vmatpush3.msra.mxu0 %v700_v5  ;;  %577 = vmatpush3.msra.mxu1 %v700_v5  ;;  %v219_v11 = vld [vmem:[%s697_s27 + $0x8] sm:$0xff]  ;;  %v743_v12 = vld [vmem:[%s697_s27] sm:$0xff]  ;;  %v205_v19 = vld [vmem:[%s831_s1 + $0x18] sm:$0xff] }
  0x12   : > { %543 = vmatprep.subr.mxu0 %v703_v6  ;;  %570 = vmatprep.subr.mxu1 %v703_v6  ;;  %v211_v18 = vld [vmem:[%s832_s2 + $0x8] sm:$0xff]  ;;  %v209_v20 = vld [vmem:[%s831_s1 + $0x38] sm:$0xff]  ;;  %v214_v22 = vld [vmem:[%s832_s2 + $0x20] sm:$0xff] }
  0x13   : > { %544 = vmatpush3.msra.mxu0 %v703_v6  ;;  %578 = vmatpush3.msra.mxu1 %v703_v6  ;;  %v215_v21 = vld [vmem:[%s832_s2 + $0x28] sm:$0xff]  ;;  %v217_v23 = vld [vmem:[%s832_s2 + $0x38] sm:$0xff]  ;;  %v216_v24 = vld [vmem:[%s832_s2 + $0x30] sm:$0xff] }
  0x14   : > { %545 = vmatprep.subr.mxu0 %v710_v7  ;;  %571 = vmatprep.subr.mxu1 %v710_v7 }
  0x15   : > { %546 = vmatpush3.msra.mxu0 %v710_v7  ;;  %579 = vmatpush3.msra.mxu1 %v710_v7 }
  0x16   : > { %547 = vmatprep.subr.mxu0 %v717_v8  ;;  %572 = vmatprep.subr.mxu1 %v717_v8 }
  0x17   : > { %548 = vmatpush3.msra.mxu0 %v717_v8  ;;  %580 = vmatpush3.msra.mxu1 %v717_v8 }
  0x18   : > { %549 = vmatprep.subr.mxu0 %v724_v9  ;;  %573 = vmatprep.subr.mxu1 %v724_v9 }
  0x19   : > { %550 = vmatpush3.msra.mxu0 %v724_v9  ;;  %581 = vmatpush3.msra.mxu1 %v724_v9 }
  0x1a   : > { %551 = vmatprep.subr.mxu0 %v731_v10  ;;  %574 = vmatprep.subr.mxu1 %v731_v10 }
  0x1b   : > { %552 = vmatpush3.msra.mxu0 %v731_v10  ;;  %582 = vmatpush3.msra.mxu1 %v731_v10 }
  0x1c   : > { %553 = vmatprep.subr.mxu0 %v219_v11  ;;  %575 = vmatprep.subr.mxu1 %v219_v11 }
  0x1d   : > { %554 = vmatpush3.msra.mxu0 %v219_v11  ;;  %583 = vmatpush3.msra.mxu1 %v219_v11 }
  0x1e   : > { %555 = vmatprep.subr.mxu0 %v743_v12  ;;  %576 = vmatprep.subr.mxu1 %v743_v12 }
  0x1f   : > { %556 = vmatpush3.msra.mxu0 %v743_v12  ;;  %584 = vmatpush3.msra.mxu1 %v743_v12 }
  0x20   : > { %558 = vmatmul.mubr.msk.f32.vlgmr.msra.gmra.mxu0 %vm266_vm0, %v203_v13  ;;  %564 = vmatmul.mubr.msk.f32.vlgmr.msra.gmra.mxu1 %vm266_vm0, %v207_v14 }
  0x21   : > { %560 = vmatprep.mubr.msk.f32.mxu0 %vm266_vm0, %v204_v15  ;;  %566 = vmatprep.mubr.msk.f32.mxu1 %vm266_vm0, %v208_v16 }
  0x22   : > { %243 = vperm.xlu1 %611, %v213_v17   ;;  %233 = vperm.xlu0 %610, %v211_v18  }
  0x24   : > { %561 = vmatmul.mubr.msk.f32.gmra.mxu0 %vm266_vm0, %v205_v19  ;;  %567 = vmatmul.mubr.msk.f32.gmra.mxu1 %vm266_vm0, %v209_v20 }
  0x26   : > { %253 = vperm.xlu1 %611, %v215_v21   ;;  %248 = vperm.xlu0 %610, %v214_v22  }
  0x2a   : > { %263 = vperm.xlu1 %611, %v217_v23   ;;  %258 = vperm.xlu0 %610, %v216_v24  }
  0x8a   : > { %v239_v25 = vpop.permute.xlu1 %238  ;;  %v229_v26 = vpop.permute.xlu0 %228 }
  0x9d   : > { %v244_v27 = vpop.permute.xlu1 %243  ;;  %v234_v28 = vpop.permute.xlu0 %233 }
  0xa1   : > { %v254_v29 = vpop.permute.xlu1 %253  ;;  %v249_v30 = vpop.permute.xlu0 %248 }
  0xa5   : > { %v264_v43 = vpop.permute.xlu1 %263  ;;  %v259_v44 = vpop.permute.xlu0 %258 }
  0xe0   : > { %v559_v31 = vpop.f32.mrf.mxu0  ;;  %v565_v32 = vpop.f32.mrf.mxu1 }
  0xe1   : > { %v363_v33 = vadd.f32 %v559_v31, %v234_v28  ;;  %v383_v34 = vadd.f32 %v565_v32, %v254_v29 }
  0xe2   : > { %v357_v35 = vpop.f32.mrf.mxu0  ;;  %v377_v36 = vpop.f32.mrf.mxu1 }
  0xe3   : > { %v397_v37 = vmax.f32 %v363_v33, 0.0  ;;  %v401_v38 = vmax.f32 %v383_v34, 0.0  ;;  %v358_v39 = vadd.f32 %v357_v35, %v229_v26  ;;  %v378_v40 = vadd.f32 %v377_v36, %v249_v30 }
  0xe4   : > { %v562_v41 = vpop.f32.mrf.mxu0  ;;  %v568_v42 = vpop.f32.mrf.mxu1 }
  0xe5   : > { %v405_v45 = vadd.f32 %v397_v37, %v219_v11  ;;  %v409_v46 = vadd.f32 %v401_v38, %v710_v7  ;;  %v396_v47 = vmax.f32 %v358_v39, 0.0  ;;  %v400_v48 = vmax.f32 %v378_v40, 0.0 }
  0xe6   : > { %v373_v49 = vadd.f32 %v562_v41, %v244_v27  ;;  %v393_v50 = vadd.f32 %v568_v42, %v264_v43  ;;  %v367_v51 = vpop.f32.mrf.mxu0  ;;  %v387_v52 = vpop.f32.mrf.mxu1 }
  0xe7   : > { %414 = vst.msk [vmem:[%s796_s5 + $0x8] sm:$0xff] %vm412_vm1, %v405_v45  ;;  %418 = vst.msk [vmem:[%s796_s5 + $0x28] sm:$0xff] %vm412_vm1, %v409_v46  ;;  %v404_v53 = vadd.f32 %v396_v47, %v743_v12  ;;  %v408_v54 = vadd.f32 %v400_v48, %v717_v8  ;;  %v368_v55 = vadd.f32 %v367_v51, %v239_v25 }
  0xe8   : > { %v388_v56 = vadd.f32 %v387_v52, %v259_v44  ;;  %v399_v57 = vmax.f32 %v373_v49, 0.0  ;;  %v403_v58 = vmax.f32 %v393_v50, 0.0 }
  0xe9   : > { %413 = vst.msk [vmem:[%s796_s5] sm:$0xff] %vm412_vm1, %v404_v53  ;;  %417 = vst.msk [vmem:[%s796_s5 + $0x20] sm:$0xff] %vm412_vm1, %v408_v54  ;;  %v398_v59 = vmax.f32 %v368_v55, 0.0 }
  0xea   : > { %v402_v60 = vmax.f32 %v388_v56, 0.0  ;;  %v407_v61 = vadd.f32 %v399_v57, %v724_v9  ;;  %v411_v62 = vadd.f32 %v403_v58, %v700_v5 }
  0xeb   : > { %v406_v63 = vadd.f32 %v398_v59, %v731_v10 }
  0xec   : > { %v410_v0 = vadd.f32 %v402_v60, %v703_v6  ;;  %416 = vst.msk [vmem:[%s796_s5 + $0x18] sm:$0xff] %vm412_vm1, %v407_v61  ;;  %420 = vst.msk [vmem:[%s796_s5 + $0x38] sm:$0xff] %vm412_vm1, %v411_v62 }
  0xed   : > { %415 = vst.msk [vmem:[%s796_s5 + $0x10] sm:$0xff] %vm412_vm1, %v406_v63 }
  0xee   : > { %419 = vst.msk [vmem:[%s796_s5 + $0x30] sm:$0xff] %vm412_vm1, %v410_v0 }
  0xef PF: > { %s13_s14 = sadd.s32 1, %s634_s14   ;;  %s834_s12 = smov %s630_s13 }
  0xf0   : > { %p10_p5 = scmp.ge.s32.totalorder %s13_s14, 4   ;;  %s835_s13 = smov %s837_s15 }
  0xf2   :  { %12 = sbr.rel (!%p10_p5) target bundleno = 2 (0x2), region = 62 }

</bundles_post_ra>
